<compile_context>
chip_gen: v6e
topology: v6e:2x2x1
jax: 0.10.0
libtpu: 0.0.40
codegen_flags: <defaults>
</compile_context>

<pallas_src>
from math import sqrt

import jax
import jax.numpy as jnp
from jax import lax
from jax.experimental import pallas as pl
from jax.experimental.pallas import tpu as pltpu


def _pair(v):
    return tuple(v) if isinstance(v, (tuple, list)) else (v, v)


def _untied_bias_matmul_kernel(w_ref, b_ref, p_ref, o_ref):
    """One (batch, M-tile) grid step.

    w_ref: (Cout, K)      flattened conv weight (compute dtype)
    b_ref: (Cout, TM)     untied-bias tile (f32)
    p_ref: (1, K, TM)     im2col patches tile for this image (compute dtype)
    o_ref: (1, Cout, TM)  output tile (out dtype), lane-dense along M
    """
    acc = jnp.dot(w_ref[...], p_ref[0], preferred_element_type=jnp.float32)
    o_ref[0] = (acc + b_ref[...]).astype(o_ref.dtype)


def conv2d_untied_bias(x_nchw, weight_oihw, bias_chw, *,
                       stride=1, padding=0, dilation=1, groups=1,
                       compute_dtype=jnp.float32):
    """Equivalent of Conv2dUntiedBias.forward.  Inputs/outputs are NCHW."""
    if groups != 1:
        # TODO(synk): grouped convolution not implemented in the kernel.
        raise NotImplementedError("groups != 1 not supported")

    sh, sw = _pair(stride)
    ph, pw = _pair(padding)
    dh, dw = _pair(dilation)

    n, c_in, h_in, w_in = x_nchw.shape
    c_out, c_in_w, kh, kw = weight_oihw.shape
    assert c_in_w == c_in
    h_out = (h_in + 2 * ph - dh * (kh - 1) - 1) // sh + 1
    w_out = (w_in + 2 * pw - dw * (kw - 1) - 1) // sw + 1
    assert bias_chw.shape == (c_out, h_out, w_out)

    m = h_out * w_out
    k_flat = c_in * kh * kw
    out_dtype = x_nchw.dtype

    # ---- M tiling: the lane dim of every kernel operand is an M tile -------
    m_p = ((m + 127) // 128) * 128          # pad M up to a lane multiple
    tm = 128                                # grow tile while keeping >=4 steps
    while (tm * 2 <= min(m_p, 1024) and m_p % (tm * 2) == 0
           and n * (m_p // (tm * 2)) >= 4):
        tm *= 2
    num_m = m_p // tm

    # ---- wrapper-side im2col (plain XLA; K order = (ci, kh, kw)) -----------
    x_pad = jnp.pad(x_nchw, ((0, 0), (0, 0), (ph, ph), (pw, pw)))
    x_pad = x_pad.astype(compute_dtype)
    taps = []
    for i in range(kh):
        for j in range(kw):
            win = lax.slice(
                x_pad,
                (0, 0, i * dh, j * dw),
                (n, c_in,
                 i * dh + (h_out - 1) * sh + 1,
                 j * dw + (w_out - 1) * sw + 1),
                (1, 1, sh, sw))                        # (N, Cin, Hout, Wout)
            taps.append(win.reshape(n, c_in, 1, m))
    patches = jnp.concatenate(taps, axis=2)            # (N, Cin, KH*KW, M)
    patches = patches.reshape(n, k_flat, m)
    if m_p != m:
        patches = jnp.pad(patches, ((0, 0), (0, 0), (0, m_p - m)))

    # (Cout, Cin, KH, KW) -> (Cout, K): native layout, matches patches K order.
    w2d = weight_oihw.reshape(c_out, k_flat).astype(compute_dtype)

    # (Cout, Hout, Wout) -> (Cout, M_p): native layout; f32 bias add.
    b2d = bias_chw.reshape(c_out, m).astype(jnp.float32)
    if m_p != m:
        b2d = jnp.pad(b2d, ((0, 0), (0, m_p - m)))

    # ---- VMEM budget from real (8,128)-tile-rounded block footprints -------
    csz = jnp.dtype(compute_dtype).itemsize
    osz = jnp.dtype(out_dtype).itemsize

    def _tile_bytes(rows, cols, itemsize):
        return (-(-rows // 8) * 8) * (-(-cols // 128) * 128) * itemsize

    w_blk = _tile_bytes(c_out, k_flat, csz)
    b_blk = _tile_bytes(c_out, tm, 4)
    p_blk = _tile_bytes(k_flat, tm, csz)
    o_blk = _tile_bytes(c_out, tm, osz)
    acc_tmp = 2 * _tile_bytes(c_out, tm, 4)            # matmul acc + bias-add tmp
    vmem_need = 2 * (p_blk + o_blk + w_blk + b_blk) + acc_tmp + (2 << 20)
    try:
        vmem_cap = int(pltpu.get_tpu_info().vmem_capacity_bytes)
    except Exception:
        vmem_cap = 64 * 1024 * 1024                    # conservative (v7x per-TC)
    vmem_limit = int(min(max(vmem_need, 8 << 20), vmem_cap - (8 << 20)))

    cost = pl.CostEstimate(
        flops=2 * n * m * k_flat * c_out,
        transcendentals=0,
        bytes_accessed=int(n * k_flat * m * csz       # patches read
                           + c_out * k_flat * csz     # weight read
                           + c_out * m * 4            # bias read
                           + n * c_out * m * osz))    # output write

    out_p = pl.pallas_call(
        _untied_bias_matmul_kernel,
        out_shape=jax.ShapeDtypeStruct((n, c_out, m_p), out_dtype),
        grid_spec=pltpu.PrefetchScalarGridSpec(
            num_scalar_prefetch=0,
            grid=(n, num_m),
            in_specs=[
                # weight / bias block indices never change with the batch axis,
                # so Pallas keeps them resident (no re-DMA per step).
                pl.BlockSpec((c_out, k_flat), lambda b, mi: (0, 0)),
                pl.BlockSpec((c_out, tm), lambda b, mi: (0, mi)),
                pl.BlockSpec((1, k_flat, tm), lambda b, mi: (b, 0, mi)),
            ],
            out_specs=pl.BlockSpec((1, c_out, tm), lambda b, mi: (b, 0, mi)),
        ),
        compiler_params=pltpu.CompilerParams(
            dimension_semantics=("parallel", "parallel"),
            vmem_limit_bytes=vmem_limit),
        cost_estimate=cost,
    )(w2d, b2d, patches)

    # Strip the M padding; reshape back to NCHW (no transpose needed).
    return out_p[:, :, :m].reshape(n, c_out, h_out, w_out)


def _reference(x, weight, bias, stride, padding, dilation):
    ref = lax.conv_general_dilated(
        x, weight, window_strides=stride,
        padding=[(padding[0], padding[0]), (padding[1], padding[1])],
        rhs_dilation=dilation,
        dimension_numbers=("NCHW", "OIHW", "NCHW"))
    return ref + bias[None]


if __name__ == "__main__":
    # Module config: Conv2dUntiedBias(height=16, width=16, 4, 8, 3,
    #                                 stride=1, padding=1)
    N, C_IN, H, W = 2, 4, 16, 16
    C_OUT, K = 8, 3
    STRIDE, PAD, DIL = (1, 1), (1, 1), (1, 1)
    H_OUT = (H + 2 * PAD[0] - DIL[0] * (K - 1) - 1) // STRIDE[0] + 1
    W_OUT = (W + 2 * PAD[1] - DIL[1] * (K - 1) - 1) // STRIDE[1] + 1

    key = jax.random.PRNGKey(0)
    kx, kw_, kb = jax.random.split(key, 3)

    # Parameter init mirroring reset_parameters(): uniform(-stdv, stdv),
    # stdv = 1 / sqrt(in_channels * KH * KW).
    stdv = 1.0 / sqrt(C_IN * K * K)
    weight = jax.random.uniform(kw_, (C_OUT, C_IN, K, K),
                                minval=-stdv, maxval=stdv, dtype=jnp.float32)
    bias = jax.random.uniform(kb, (C_OUT, H_OUT, W_OUT),
                              minval=-stdv, maxval=stdv, dtype=jnp.float32)
    x = jax.random.normal(kx, (N, C_IN, H, W), dtype=jnp.float32)

    ref = _reference(x, weight, bias, STRIDE, PAD, DIL)

    # Default path: f32 compute (exact PyTorch semantics), tight tolerance.
    out_f32 = conv2d_untied_bias(x, weight, bias, stride=STRIDE, padding=PAD,
                                 dilation=DIL)
    out_f32 = jax.block_until_ready(out_f32)
    assert out_f32.shape == (N, C_OUT, H_OUT, W_OUT)
    assert jnp.allclose(out_f32, ref, rtol=1e-5, atol=1e-5)

    # Explicit opt-in fast path: bf16 MXU compute with f32 accumulation.
    out_bf16 = conv2d_untied_bias(x, weight, bias, stride=STRIDE, padding=PAD,
                                  dilation=DIL, compute_dtype=jnp.bfloat16)
    out_bf16 = jax.block_until_ready(out_bf16)
    assert out_bf16.shape == (N, C_OUT, H_OUT, W_OUT)
    assert jnp.allclose(out_bf16, ref, rtol=3e-2, atol=3e-2)

    # Second config exercising stride + M padding: stride=2, padding=0
    # (module instantiated with height=width=7 for this geometry).
    STRIDE2, PAD2 = (2, 2), (0, 0)
    H2 = (H - DIL[0] * (K - 1) - 1) // STRIDE2[0] + 1
    W2 = (W - DIL[1] * (K - 1) - 1) // STRIDE2[1] + 1
    bias2 = jax.random.uniform(jax.random.PRNGKey(1), (C_OUT, H2, W2),
                               minval=-stdv, maxval=stdv, dtype=jnp.float32)
    ref2 = _reference(x, weight, bias2, STRIDE2, PAD2, DIL)
    out2 = conv2d_untied_bias(x, weight, bias2, stride=STRIDE2, padding=PAD2,
                              dilation=DIL)
    out2 = jax.block_until_ready(out2)
    assert out2.shape == (N, C_OUT, H2, W2)
    assert jnp.allclose(out2, ref2, rtol=1e-5, atol=1e-5)

    print("KERNEL_OK")
</pallas_src>

<mosaic_0001>
module attributes {stable_mosaic.version = 11 : i64} {
  func.func @_untied_bias_matmul_kernel(%arg0: i32, %arg1: i32, %arg2: memref<8x36xf32, #tpu.memory_space<vmem>>, %arg3: memref<8x128xf32, #tpu.memory_space<vmem>>, %arg4: memref<1x36x128xf32, #tpu.memory_space<vmem>>, %arg5: memref<1x8x128xf32, #tpu.memory_space<vmem>>) attributes {dimension_semantics = [#tpu.dimension_semantics<parallel>, #tpu.dimension_semantics<parallel>], iteration_bounds = array<i64: 2, 2>, scalar_prefetch = 0 : i64, scratch_operands = 0 : i64, tpu.core_type = #tpu.core_type<tc>, window_params = [{pipeline_mode = #tpu.pipeline_mode<synchronous>, transform_indices = @transform_0, window_bounds = array<i64: 8, 36>}, {transform_indices = @transform_1, window_bounds = array<i64: 8, 128>}, {transform_indices = @transform_2, window_bounds = array<i64: 1, 36, 128>}, {transform_indices = @transform_3, window_bounds = array<i64: 1, 8, 128>}]} {
    %c0 = arith.constant 0 : index
    %c0_0 = arith.constant 0 : index
    %0 = vector.load %arg2[%c0, %c0_0] : memref<8x36xf32, #tpu.memory_space<vmem>>, vector<8x36xf32>
    %c0_1 = arith.constant 0 : index
    %c0_2 = arith.constant 0 : index
    %c0_3 = arith.constant 0 : index
    %1 = vector.load %arg4[%c0_1, %c0_2, %c0_3] : memref<1x36x128xf32, #tpu.memory_space<vmem>>, vector<1x36x128xf32>
    %2 = vector.shape_cast %1 : vector<1x36x128xf32> to vector<36x128xf32>
    %cst = arith.constant dense<0.000000e+00> : vector<8x128xf32>
    %3 = tpu.matmul %0, %2, %cst {dimension_numbers = #tpu.dot_dimension_numbers<[1], [0], [0], [1], [0, 0, 1, 1], [], []>} : vector<8x36xf32>, vector<36x128xf32>, vector<8x128xf32> -> vector<8x128xf32>
    %c0_4 = arith.constant 0 : index
    %c0_5 = arith.constant 0 : index
    %4 = vector.load %arg3[%c0_4, %c0_5] : memref<8x128xf32, #tpu.memory_space<vmem>>, vector<8x128xf32>
    %5 = arith.addf %3, %4 : vector<8x128xf32>
    %c0_6 = arith.constant 0 : index
    %c0_7 = arith.constant 0 : index
    %c0_8 = arith.constant 0 : index
    %6 = vector.load %arg5[%c0_6, %c0_7, %c0_8] : memref<1x8x128xf32, #tpu.memory_space<vmem>>, vector<1x8x128xf32>
    %7 = vector.shape_cast %6 : vector<1x8x128xf32> to vector<8x128xf32>
    %8 = vector.shape_cast %5 : vector<8x128xf32> to vector<1x8x128xf32>
    tpu.vector_store %arg5[%c0_6, %c0_7, %c0_8], %8 {strides = array<i32>} : memref<1x8x128xf32, #tpu.memory_space<vmem>>, vector<1x8x128xf32>,
    return
  }
  func.func @transform_0(%arg0: i32, %arg1: i32) -> (i32, i32) {
    %c0_i32 = arith.constant 0 : i32
    %c0_i32_0 = arith.constant 0 : i32
    %c0_i32_1 = arith.constant 0 : i32
    return %c0_i32, %c0_i32_0 : i32, i32
  }
  func.func @transform_1(%arg0: i32, %arg1: i32) -> (i32, i32) {
    %c0_i32 = arith.constant 0 : i32
    %c0_i32_0 = arith.constant 0 : i32
    return %c0_i32, %arg1 : i32, i32
  }
  func.func @transform_2(%arg0: i32, %arg1: i32) -> (i32, i32, i32) {
    %c0_i32 = arith.constant 0 : i32
    %c0_i32_0 = arith.constant 0 : i32
    return %arg0, %c0_i32, %arg1 : i32, i32, i32
  }
  func.func @transform_3(%arg0: i32, %arg1: i32) -> (i32, i32, i32) {
    %c0_i32 = arith.constant 0 : i32
    %c0_i32_0 = arith.constant 0 : i32
    return %arg0, %c0_i32, %arg1 : i32, i32, i32
  }
}

</mosaic_0001>

<bundles_post_ra>
// kernel: tpu_custom_call.1
= control target key start
LH: loop header
LB: loop body
LE: loop exit
PB: predicated region body
PF: predicated region fallthrough
CT: control target
= control target key end

     0   :  { %s826_s0 = inlined_call_operand.vmem [shape: f32[8,36], index: 0, kind: input, shape index: {}]   ;;  %s827_s1 = inlined_call_operand.vmem [shape: f32[8,256], index: 1, kind: input, shape index: {}]   ;;  %s828_s2 = inlined_call_operand.vmem [shape: f32[2,36,256], index: 2, kind: input, shape index: {}]   ;;  %s829_s3 = inlined_call_operand.hbm [shape: f32[2,8,256], index: 3, kind: output, shape index: {}]  }
   0x1   :  { %830 = sst [smem:[#allocation6_spill]] %s826_s0 }
   0x2   :  { %8 = vsyncpa [#allocation4], 0 }
   0x3   :  { %10 = vsyncpa [#allocation4 + $0x1], 0  ;;  %s676_s12 = smov 0   ;;  %s678_s13 = smov 0  }
   0x4   :  { %s680_s14 = smov 0   ;;  %s682_s15 = smov 0  }
   0x5   :  { %s684_s16 = smov 0   ;;  %s686_s17 = smov 0  }
   0x6   :  { %s688_s18 = smov 0   ;;  %s690_s19 = smov 0  }
   0x7 LB: > { %s449_s20 = sadd.s32 4294967295, %s651_s19   ;;  %s450_s21 = sadd.s32 4294967294, %s651_s19   ;;  %s651_s19 = sphi %s690_s19, %s16_s19   ;;  %s647_s18 = sphi %s688_s18, %s841_s18   ;;  %s643_s17 = sphi %s686_s17, %s840_s17   ;;  %s639_s16 = sphi %s684_s16, %s839_s16   ;;  %s635_s15 = sphi %s682_s15, %s838_s15   ;;  %s631_s14 = sphi %s680_s14, %s837_s14   ;;  %s627_s13 = sphi %s678_s13, %s836_s13   ;;  %s623_s12 = sphi %s676_s12, %s835_s12  }
   0x8   : > { %s25_s22 = sadd.s32 1, %s643_s17  ;;  %s28_s23 = sadd.s32 1, %s647_s18 }
   0x9   : > { %p26_p0 = scmp.ge.s32.totalorder %s25_s22, 2  ;;  %p91_p1 = scmp.ne.s32.totalorder %s631_s14, %s627_s13 }
   0xa   : > { %p92_p2 = scmp.eq.s32.totalorder %s651_s19, 0  ;;  %p123_p5 = scmp.eq.s32.totalorder %s449_s20, 3 }
   0xb   : > { %s843_s22 = smov (%p26_p0, %s25_s22), 0  ;;  %s845_s23 = smov (!%p26_p0, %s28_s23), %s647_s18 }
   0xc   : > { %s80_s24 = ssub.s32 %s643_s17, %s843_s22  ;;  %p728_p3 = por %p92_p2, %p91_p1 }
   0xd   : > { %p30_p4 = scmp.ge.s32.totalorder %s845_s23, 2  ;;  %p128_p6 = scmp.ne.s32.totalorder %s627_s13, %s623_s12 }
   0xe   : > { %p129_p7 = scmp.eq.s32.totalorder %s450_s21, 3  ;;  %p736_p8 = por %p123_p5, %p91_p1 }
   0xf   : > { %s847_s23 = smov (%p30_p4, %s845_s23), 0  ;;  %s84_s30 = sadd.s32 1, %s631_s14 }
  0x10   : > { %p740_p9 = por %p129_p7, %p128_p6  ;;  %s79_s28 = ssub.s32 %s647_s18, %s847_s23 }
  0x11   : > { %s81_s29 = sor.u32 %s80_s24, %s79_s28  ;;  %p452_p11 = scmp.ge.s32.totalorder %s651_s19, 4 }
  0x12   : > { %p82_p10 = scmp.eq.s32.totalorder %s81_s29, 0 }
  0x13   : > { %148 = sbr.rel (%p452_p11) target bundleno = 34 (0x22), region = 20 }
  0x14   : > { %s748_s4 = scalar_select %p82_p10, %s631_s14, %s84_s30  }
  0x18   : > { %158 = sbr.rel (!%p728_p3) target bundleno = 34 (0x22), region = 28  ;;  %s160_s5 = sand.u32 (%p728_p3), 1, %s631_s14  }
  0x19   : > { %s484_s6 = smul.u32 (%p728_p3), 10, %s647_s18 }
  0x1a   : > { %s483_s7 = smul.u32 (%p728_p3), 40, %s160_s5 }
  0x1b   : > { %s164_s8 = sadd.s32 (%p728_p3), %s643_s17, %s484_s6 }
  0x1c   : > { %s453_s9 = sshll.u32 (%p728_p3), %s164_s8, 3  ;;  %s162_s21 = scalar_lea.vmem (%p728_p3), [#allocation2], %s483_s7 }
  0x1d   : > { %s166_s20 = scalar_lea.vmem %s828_s2, %s453_s9 }
  0x1e   : > { %v203_v0 = vld [vmem:[%s166_s20] sm:$0xff]  ;;  %v205_v1 = vld [vmem:[%s166_s20 + $0x10] sm:$0xff] }
  0x1f   : > { %v207_v2 = vld [vmem:[%s166_s20 + $0x20] sm:$0xff]  ;;  %204 = vst [vmem:[%s162_s21] sm:$0xff] %v203_v0  ;;  %206 = vst [vmem:[%s162_s21 + $0x8] sm:$0xff] %v205_v1  ;;  %v209_v3 = vld [vmem:[%s166_s20 + $0x30] sm:$0xff] }
  0x20   : > { %208 = vst [vmem:[%s162_s21 + $0x10] sm:$0xff] %v207_v2  ;;  %v211_v4 = vld [vmem:[%s166_s20 + $0x40] sm:$0xff]  ;;  %210 = vst [vmem:[%s162_s21 + $0x18] sm:$0xff] %v209_v3 }
  0x21   : > { %212 = vst [vmem:[%s162_s21 + $0x20] sm:$0xff] %v211_v4 }
  0x22 PF: > { %p454_p12 = scmp.ge.s32.totalorder %s651_s19, 1  ;;  %p217_p13 = scmp.lt.s32.totalorder %s651_s19, 5 }
  0x24   : > { %p218_p0 = pnand %p454_p12, %p217_p13 }
  0x25   : > { %s762_s24 = sand.u32 (!%p218_p0), 1, %s627_s13   ;;  %s834_s0 = sld [smem:[#allocation6_spill]] (!%p218_p0) }
  0x26   : > { %221 = sbr.rel (%p218_p0) target bundleno = 262 (0x106), region = 66  ;;  %p251_p1 = scmp.lt.s32.totalorder (!%p218_p0), %s635_s15, 1 }
  0x27   : > { %s485_s25 = smul.u32 (!%p218_p0), 40, %s762_s24  ;;  %s455_s6 = sshll.u32 (!%p218_p0), %s762_s24, 3 }
  0x28   : > { %s460_s8 = sshll.u32 (!%p218_p0), %s639_s16, 1  ;;  %s342_s16 = scalar_lea.sflag (!%p218_p0), [#allocation4], %s762_s24 }
  0x29   : > { %s226_s28 = scalar_lea.vmem (!%p218_p0), [#allocation2], %s485_s25  ;;  %s353_s20 = sadd.s32 (!%p218_p0), %s635_s15, %s460_s8 }
  0x2a   : > { %s461_s21 = sshll.u32 (!%p218_p0), %s353_s20, 7  ;;  %s250_s25 = scalar_lea.vmem (!%p218_p0), [#allocation3], %s455_s6 }
  0x2b   : > { %v653_v5 = vmov 0.0   ;;  %vm654_vm0 = vmmov 0   ;;  %vm266_vm1 = vcmask 1043456   ;;  %v260_v6 = vld [vmem:[%s226_s28 + $0x20] sm:$0xf]  ;;  %v259_v7 = vld [vmem:[%s226_s28 + $0x18] sm:$0xff] }
  0x2c   : > { %470 = vmatprep.subr.mxu0 %v653_v5  ;;  %480 = vmatprep.mubr.msk.f32.mxu0 %vm654_vm0, %v653_v5  ;;  %v258_v8 = vld [vmem:[%s226_s28 + $0x10] sm:$0xff]  ;;  %v257_v9 = vld [vmem:[%s226_s28 + $0x8] sm:$0xff]  ;;  %v256_v10 = vld [vmem:[%s226_s28] sm:$0xff]  ;;  %vm262_vm2 = vcmask 293888   ;;  %s252_s5 = scalar_select %p251_p1, %s635_s15, 1 }
  0x2d   : > { %471 = vmatpush3.msk.msra.mxu0 %vm266_vm1, %v260_v6  ;;  %v255_v11 = vld [vmem:[%s834_s0] sm:$0xff]  ;;  %s357_s28 = sshll.u32 %s250_s25, 4  ;;  %s779_s0 = scalar_lea.hbm %s829_s3, %s461_s21  ;;  %s358_s28 = int_to_ptr.vmem [resolvable:$true] %s357_s28 }
  0x2e   : > { %472 = vmatprep.subr.mxu0 %v653_v5  ;;  %s456_s7 = sshll.u32 %s252_s5, 3  ;;  %s559_s5 = scalar_lea.vmem %s358_s28, 128 }
  0x2f   : > { %473 = vmatpush3.msra.mxu0 %v259_v7  ;;  %s254_s11 = scalar_lea.vmem %s827_s1, %s456_s7  ;;  %p560_p2 = scmp.ne.s32.totalorder %s358_s28, %s559_s5 }
  0x30   : > { %474 = vmatprep.subr.mxu0 %v653_v5  ;;  %v261_v12 = vld [vmem:[%s254_s11] sm:$0xff]  ;;  %s655_s15 = smov [#allocation3]  }
  0x31   : > { %475 = vmatpush3.msra.mxu0 %v258_v8  ;;  %p561_p3 = pnand %p560_p2, %p736_p8  ;;  %s563_s7 = sshll.u32 %s655_s15, 4  ;;  %s564_s7 = int_to_ptr.vmem [resolvable:$false] %s563_s7 }
  0x32   : > { %476 = vmatprep.subr.mxu0 %v653_v5  ;;  %s565_s6 = scalar_lea.vmem %s564_s7, 256  ;;  %p566_p5 = scmp.lt.s32.totalorder %s358_s28, %s564_s7 }
  0x33   : > { %477 = vmatpush3.msra.mxu0 %v257_v9  ;;  %p562_p4 = pneg %p561_p3  ;;  %p567_p6 = scmp.lt.s32.totalorder %s565_s6, %s559_s5 }
  0x34   : > { %478 = vmatprep.subr.mxu0 %v653_v5 }
  0x35   : > { %479 = vmatpush3.msra.mxu0 %v256_v10  ;;  %p568_p7 = por %p567_p6, %p566_p5 }
  0x36   : > { %481 = vmatmul.mubr.msk.f32.vlgmr.msra.gmra.mxu0 %vm262_vm2, %v255_v11 }
  0x37   : > { %p569_p10 = pnand %p568_p7, %p562_p4 }
  0xf6   : > { %v336_v13 = vpop.f32.mrf.mxu0 }
  0xf7   : > { %v337_v14 = vadd.f32 %v336_v13, %v261_v12 }
  0xf8   : > { %v482_v15 = vpop.f32.mrf.mxu0 }
  0xf9   : > { %340 = vst [vmem:[%s250_s25] sm:$0xff] %v337_v14 }
  0xfa   : > { %572 = shalt.err (!%p569_p10)
}
  0xfb   : > { %s573_s8 = scalar_lea.hbm %s779_s0, 128  ;;  %s577_s10 = scalar_lea.hbm %s829_s3, 512 }
  0xfc   : > { %p574_p11 = scmp.ne.s32.totalorder %s779_s0, %s573_s8  ;;  %p578_p0 = scmp.lt.s32.totalorder %s779_s0, %s829_s3 }
  0xfd   : > { %p579_p1 = scmp.lt.s32.totalorder %s577_s10, %s573_s8 }
  0xfe   : > { %p575_p12 = pnand %p574_p11, %p736_p8 }
  0xff   : > { %p580_p2 = por %p579_p1, %p578_p0 }
 0x100   : > { %p576_p13 = pneg %p575_p12 }
 0x102   : > { %p581_p3 = pnand %p580_p2, %p576_p13 }
 0x104   : > { %584 = shalt.err (!%p581_p3)
}
 0x105   : > { %486 = dma.vmem_to_hbm [thread:$0]  (%p736_p8), %s358_s28, 128, %s779_s0, %s342_s16  }
 0x106 PF: > { %p492_p4 = scmp.ge.s32.totalorder %s651_s19, 2  ;;  %s369_s21 = sand.u32 1, %s623_s12  }
 0x107   : > { %s370_s25 = scalar_lea.sflag [#allocation4], %s369_s21 }
 0x108   : > { %p489_p5 = pnand %p492_p4, %p740_p9 }
 0x10a   : > { %p490_p6 = pneg %p489_p5 }
 0x10c   : > { %618 = dma.done.wait (%p490_p6), %s370_s25, 128  }
 0x10d   : > { %620 = vsyncadd (%p490_p6), %s370_s25, 4294967168  ;;  %s16_s19 = sadd.s32 1, %s651_s19   ;;  %s835_s12 = smov %s627_s13 }
 0x10e   : > { %p13_p7 = scmp.ge.s32.totalorder %s16_s19, 6   ;;  %s836_s13 = smov %s631_s14 }
 0x10f   : > { %s837_s14 = smov %s748_s4  ;;  %s838_s15 = smov %s643_s17 }
 0x110   : > { %s839_s16 = smov %s647_s18  ;;  %s840_s17 = smov %s843_s22 }
 0x111   : > { %s841_s18 = smov %s847_s23  ;;  %15 = sbr.rel (!%p13_p7) target bundleno = 7 (0x7), region = 113 }
 0x116   :  { %375 = vsyncpa [#allocation4], 1 }
 0x117   :  { %377 = vsyncpa [#allocation4 + $0x1], 1 }

</bundles_post_ra>
